<compile_context>
chip_gen: v7x
topology: tpu7x:2x2x1
jax: 0.10.0
libtpu: 0.0.40
codegen_flags: <defaults>
</compile_context>

<pallas_src>
import functools

import jax
import jax.numpy as jnp
from jax.experimental import pallas as pl
from jax.experimental.pallas import tpu as pltpu


def _make_fullmodel_kernel(inv_n: float, compute_dtype):
    """Build the fused MLP+MSE kernel.

    inv_n = 1/(B*d_out) is baked in so every tile emits an already-normalized
    partial of the mean; compute_dtype controls the MXU operand precision.
    """

    def kernel(x_ref, t_ref, w1_ref, b1_ref, w2_ref, b2_ref, out_ref):
        x = x_ref[...]                                   # (TB, D_in)
        w1 = w1_ref[...]
        w2 = w2_ref[...]
        if compute_dtype != jnp.float32:                 # optional bf16 MXU path
            x = x.astype(compute_dtype)
            w1 = w1.astype(compute_dtype)
            w2 = w2.astype(compute_dtype)

        # model: Linear -> ReLU -> Linear (MXU matmuls, f32 accumulation).
        h = jnp.dot(x, w1, preferred_element_type=jnp.float32)       # (TB, H)
        h = jnp.maximum(h + b1_ref[...], 0.0)
        if compute_dtype != jnp.float32:
            h = h.astype(compute_dtype)
        y = jnp.dot(h, w2, preferred_element_type=jnp.float32)       # (TB, D_out)
        y = y + b2_ref[...]

        # loss: mean squared error.  Single fused reduce; normalized partial
        # goes out through the scalar/SMEM path (no lane-sparse vector store).
        diff = y - t_ref[...]
        out_ref[0, 0] = jnp.sum(diff * diff) * inv_n

    return kernel


def full_model_loss(x, targets, w1, b1, w2, b2, *, batch_tile=None,
                    compute_dtype=jnp.float32):
    """Fused model+MSE forward. Returns the scalar loss (f32).

    batch_tile=None (default) runs the whole batch as one grid step (best for
    small/demo batches).  Set batch_tile=B//2 on v7x to split across the two
    TensorCores, or smaller for very large data-parallel batches (mind the
    per-generation scoped-VMEM limits noted above).
    """
    B, d_in = x.shape
    d_out = targets.shape[1]
    hidden = w1.shape[1]

    if batch_tile is None or batch_tile >= B:
        batch_tile = B
    assert B % batch_tile == 0, "batch must be divisible by batch_tile"
    assert batch_tile == B or batch_tile % 8 == 0, "batch tile must be sublane-aligned"
    num_tiles = B // batch_tile

    inv_n = 1.0 / float(B * d_out)
    kernel = _make_fullmodel_kernel(inv_n, compute_dtype)

    partials = pl.pallas_call(
        kernel,
        out_shape=jax.ShapeDtypeStruct((num_tiles, 1), jnp.float32),
        grid_spec=pltpu.PrefetchScalarGridSpec(
            num_scalar_prefetch=0,
            grid=(num_tiles,),
            in_specs=[
                # Activations: tiled along the batch axis.
                pl.BlockSpec((batch_tile, d_in), lambda i: (i, 0)),    # x
                pl.BlockSpec((batch_tile, d_out), lambda i: (i, 0)),   # targets
                # Parameters: grid-invariant full-array blocks (stay resident
                # in VMEM; with grid=(1,) there is no redundant re-buffering).
                pl.BlockSpec((d_in, hidden), lambda i: (0, 0)),        # w1
                pl.BlockSpec((1, hidden), lambda i: (0, 0)),           # b1
                pl.BlockSpec((hidden, d_out), lambda i: (0, 0)),       # w2
                pl.BlockSpec((1, d_out), lambda i: (0, 0)),            # b2
            ],
            # Normalized scalar partial per tile -> SMEM (scalar store path).
            out_specs=pl.BlockSpec((1, 1), lambda i: (i, 0),
                                   memory_space=pltpu.SMEM),
        ),
        compiler_params=pltpu.CompilerParams(
            # Sequential loop on v5e/v6e (near-zero effect); enables megacore
            # sharding of the batch axis on v7x when num_tiles > 1.
            dimension_semantics=("parallel",),
        ),
    )(x, targets, w1, b1, w2, b2)

    if num_tiles == 1:
        # Loss is fully computed in-kernel; just pull out the scalar.
        return partials[0, 0]
    # Partials are already scaled by 1/(B*d_out): one tiny sum finishes the mean.
    return jnp.sum(partials)


if __name__ == "__main__":
    # Lane-dense small shapes: batch=256, features multiples of 128 so vregs
    # and MXU columns are fully occupied.  Default path: grid=(1,) -> whole
    # problem in one kernel invocation, loss finished in-kernel.
    B, D_IN, H, D_OUT = 256, 128, 128, 128

    key = jax.random.PRNGKey(0)
    kx, kt, kw1, kb1, kw2, kb2 = jax.random.split(key, 6)

    x = jax.random.normal(kx, (B, D_IN), dtype=jnp.float32)
    targets = jax.random.normal(kt, (B, D_OUT), dtype=jnp.float32)

    # Deterministic parameter init (Kaiming-ish scale), shapes from the MLP.
    w1 = jax.random.normal(kw1, (D_IN, H), dtype=jnp.float32) * (1.0 / D_IN) ** 0.5
    b1 = jax.random.normal(kb1, (1, H), dtype=jnp.float32) * 0.01
    w2 = jax.random.normal(kw2, (H, D_OUT), dtype=jnp.float32) * (1.0 / H) ** 0.5
    b2 = jax.random.normal(kb2, (1, D_OUT), dtype=jnp.float32) * 0.01

    # Pure-JAX reference (f32 everywhere).
    h_ref = jnp.maximum(x @ w1 + b1, 0.0)
    y_ref = h_ref @ w2 + b2
    loss_ref = jnp.mean((y_ref - targets) ** 2)

    # 1) Default single-tile path (grid=(1,)).
    loss = full_model_loss(x, targets, w1, b1, w2, b2)
    jax.block_until_ready(loss)
    assert jnp.allclose(loss, loss_ref, rtol=1e-4, atol=1e-4), (loss, loss_ref)

    # 2) Two-tile path (batch_tile = B//2): one grid step per TensorCore on v7x.
    loss_2tile = full_model_loss(x, targets, w1, b1, w2, b2, batch_tile=B // 2)
    jax.block_until_ready(loss_2tile)
    assert jnp.allclose(loss_2tile, loss_ref, rtol=1e-4, atol=1e-4), (loss_2tile, loss_ref)

    print("KERNEL_OK")
</pallas_src>

<mosaic_0001>
module attributes {stable_mosaic.version = 11 : i64} {
  func.func @kernel(%arg0: i32, %arg1: memref<256x128xf32, #tpu.memory_space<vmem>>, %arg2: memref<256x128xf32, #tpu.memory_space<vmem>>, %arg3: memref<128x128xf32, #tpu.memory_space<vmem>>, %arg4: memref<1x128xf32, #tpu.memory_space<vmem>>, %arg5: memref<128x128xf32, #tpu.memory_space<vmem>>, %arg6: memref<1x128xf32, #tpu.memory_space<vmem>>, %arg7: memref<1x1xf32, #tpu.memory_space<smem>>) attributes {dimension_semantics = [#tpu.dimension_semantics<parallel>], iteration_bounds = array<i64: 1>, scalar_prefetch = 0 : i64, scratch_operands = 0 : i64, tpu.core_type = #tpu.core_type<tc>, window_params = [{transform_indices = @transform_0, window_bounds = array<i64: 256, 128>}, {transform_indices = @transform_1, window_bounds = array<i64: 256, 128>}, {pipeline_mode = #tpu.pipeline_mode<synchronous>, transform_indices = @transform_2, window_bounds = array<i64: 128, 128>}, {pipeline_mode = #tpu.pipeline_mode<synchronous>, transform_indices = @transform_3, window_bounds = array<i64: 1, 128>}, {pipeline_mode = #tpu.pipeline_mode<synchronous>, transform_indices = @transform_4, window_bounds = array<i64: 128, 128>}, {pipeline_mode = #tpu.pipeline_mode<synchronous>, transform_indices = @transform_5, window_bounds = array<i64: 1, 128>}, {transform_indices = @transform_6, window_bounds = array<i64: 1, 1>}]} {
    %c0 = arith.constant 0 : index
    %c0_0 = arith.constant 0 : index
    %0 = vector.load %arg1[%c0, %c0_0] : memref<256x128xf32, #tpu.memory_space<vmem>>, vector<256x128xf32>
    %c0_1 = arith.constant 0 : index
    %c0_2 = arith.constant 0 : index
    %1 = vector.load %arg3[%c0_1, %c0_2] : memref<128x128xf32, #tpu.memory_space<vmem>>, vector<128x128xf32>
    %c0_3 = arith.constant 0 : index
    %c0_4 = arith.constant 0 : index
    %2 = vector.load %arg5[%c0_3, %c0_4] : memref<128x128xf32, #tpu.memory_space<vmem>>, vector<128x128xf32>
    %cst = arith.constant dense<0.000000e+00> : vector<256x128xf32>
    %3 = tpu.matmul %0, %1, %cst {dimension_numbers = #tpu.dot_dimension_numbers<[1], [0], [0], [1], [0, 0, 1, 1], [], []>} : vector<256x128xf32>, vector<128x128xf32>, vector<256x128xf32> -> vector<256x128xf32>
    %c0_5 = arith.constant 0 : index
    %c0_6 = arith.constant 0 : index
    %4 = vector.load %arg4[%c0_5, %c0_6] : memref<1x128xf32, #tpu.memory_space<vmem>>, vector<1x128xf32>
    %5 = vector.broadcast %4 : vector<1x128xf32> to vector<256x128xf32>
    %6 = arith.addf %3, %5 : vector<256x128xf32>
    %cst_7 = arith.constant 0.000000e+00 : f32
    %7 = vector.broadcast %cst_7 : f32 to vector<256x128xf32>
    %8 = arith.maximumf %6, %7 : vector<256x128xf32>
    %cst_8 = arith.constant dense<0.000000e+00> : vector<256x128xf32>
    %9 = tpu.matmul %8, %2, %cst_8 {dimension_numbers = #tpu.dot_dimension_numbers<[1], [0], [0], [1], [0, 0, 1, 1], [], []>} : vector<256x128xf32>, vector<128x128xf32>, vector<256x128xf32> -> vector<256x128xf32>
    %c0_9 = arith.constant 0 : index
    %c0_10 = arith.constant 0 : index
    %10 = vector.load %arg6[%c0_9, %c0_10] : memref<1x128xf32, #tpu.memory_space<vmem>>, vector<1x128xf32>
    %11 = vector.broadcast %10 : vector<1x128xf32> to vector<256x128xf32>
    %12 = arith.addf %9, %11 : vector<256x128xf32>
    %c0_11 = arith.constant 0 : index
    %c0_12 = arith.constant 0 : index
    %13 = vector.load %arg2[%c0_11, %c0_12] : memref<256x128xf32, #tpu.memory_space<vmem>>, vector<256x128xf32>
    %14 = arith.subf %12, %13 : vector<256x128xf32>
    %15 = arith.mulf %14, %14 : vector<256x128xf32>
    %16 = vector.shape_cast %15 : vector<256x128xf32> to vector<1x256x128xf32>
    %cst_13 = arith.constant dense<0.000000e+00> : vector<1xf32>
    %17 = vector.multi_reduction <add>, %16, %cst_13 [1, 2] : vector<1x256x128xf32> to vector<1xf32>
    %18 = vector.shape_cast %17 : vector<1xf32> to vector<1x1x1xf32>
    %19 = vector.extract %18[0, 0, 0] : f32 from vector<1x1x1xf32>
    %cst_14 = arith.constant 3.05175781E-5 : f32
    %20 = arith.mulf %19, %cst_14 : f32
    %c0_15 = arith.constant 0 : index
    %c0_16 = arith.constant 0 : index
    %21 = memref.load %arg7[%c0_15, %c0_16] : memref<1x1xf32, #tpu.memory_space<smem>>
    memref.store %20, %arg7[%c0_15, %c0_16] : memref<1x1xf32, #tpu.memory_space<smem>>
    return
  }
  func.func @transform_0(%arg0: i32) -> (i32, i32) {
    %c0_i32 = arith.constant 0 : i32
    %c0_i32_0 = arith.constant 0 : i32
    return %arg0, %c0_i32 : i32, i32
  }
  func.func @transform_1(%arg0: i32) -> (i32, i32) {
    %c0_i32 = arith.constant 0 : i32
    %c0_i32_0 = arith.constant 0 : i32
    return %arg0, %c0_i32 : i32, i32
  }
  func.func @transform_2(%arg0: i32) -> (i32, i32) {
    %c0_i32 = arith.constant 0 : i32
    %c0_i32_0 = arith.constant 0 : i32
    %c0_i32_1 = arith.constant 0 : i32
    return %c0_i32, %c0_i32_0 : i32, i32
  }
  func.func @transform_3(%arg0: i32) -> (i32, i32) {
    %c0_i32 = arith.constant 0 : i32
    %c0_i32_0 = arith.constant 0 : i32
    %c0_i32_1 = arith.constant 0 : i32
    return %c0_i32, %c0_i32_0 : i32, i32
  }
  func.func @transform_4(%arg0: i32) -> (i32, i32) {
    %c0_i32 = arith.constant 0 : i32
    %c0_i32_0 = arith.constant 0 : i32
    %c0_i32_1 = arith.constant 0 : i32
    return %c0_i32, %c0_i32_0 : i32, i32
  }
  func.func @transform_5(%arg0: i32) -> (i32, i32) {
    %c0_i32 = arith.constant 0 : i32
    %c0_i32_0 = arith.constant 0 : i32
    %c0_i32_1 = arith.constant 0 : i32
    return %c0_i32, %c0_i32_0 : i32, i32
  }
  func.func @transform_6(%arg0: i32) -> (i32, i32) {
    %c0_i32 = arith.constant 0 : i32
    %c0_i32_0 = arith.constant 0 : i32
    return %arg0, %c0_i32 : i32, i32
  }
}

</mosaic_0001>

<bundles_post_ra>
// kernel: tpu_custom_call.1
= control target key start
LH: loop header
LB: loop body
LE: loop exit
PB: predicated region body
PF: predicated region fallthrough
CT: control target
= control target key end

     0   :  { %11 = vsyncpa [#allocation3], 0  ;;  %s1433_s0 = inlined_call_operand.hbm [shape: f32[256,128], index: 0, kind: input, shape index: {}]   ;;  %s1434_s1 = inlined_call_operand.hbm [shape: f32[256,128], index: 1, kind: input, shape index: {}]   ;;  %s1435_s2 = inlined_call_operand.hbm [shape: f32[128,128], index: 2, kind: input, shape index: {}]   ;;  %s1436_s3 = inlined_call_operand.vmem [shape: f32[1,128], index: 3, kind: input, shape index: {}]   ;;  %s1437_s4 = inlined_call_operand.hbm [shape: f32[128,128], index: 4, kind: input, shape index: {}]   ;;  %s1438_s5 = inlined_call_operand.vmem [shape: f32[1,128], index: 5, kind: input, shape index: {}]   ;;  %s1439_s6 = inlined_call_operand.hbm [shape: f32[1,1], index: 6, kind: output, shape index: {}]  }
   0x1   :  { %12 = vsyncpa [#allocation6], 0 }
   0x2   :  { %13 = vsyncpa [#allocation9], 0 }
   0x3   :  { %14 = vsyncpa [#allocation4], 0  ;;  %s1231_s21 = smov [#allocation5]   ;;  %s1232_s23 = smov [#allocation2]  }
   0x4   :  { %s32_s22 = sshll.u32 %s1231_s21, 4  ;;  %s20_s24 = sshll.u32 %s1232_s23, 4  ;;  %s33_s22 = int_to_ptr.vmem [resolvable:$true] %s32_s22  ;;  %s1273_s24 = int_to_ptr.vmem [resolvable:$true] %s20_s24 }
   0x5   :  { %s1125_s27 = scalar_lea.hbm %s1434_s1, 4096 }
   0x6   :  { %p1126_p0 = scmp.ne.s32.totalorder %s1434_s1, %s1125_s27  ;;  %p1129_p1 = scmp.lt.u32.totalorder %s1125_s27, %s1434_s1 }
   0x8   :  { %p1131_p2 = pnand %p1129_p1, %p1126_p0 }
   0xa   :  { %1134 = shalt.err (!%p1131_p2)
}
   0xb   :  { %s1135_s8 = scalar_lea.vmem %s33_s22, 4096  ;;  %p1140_p4 = scmp.lt.s32.totalorder %s33_s22, %s33_s22 }
   0xc   :  { %p1136_p3 = scmp.ne.s32.totalorder %s33_s22, %s1135_s8  ;;  %p1141_p5 = scmp.lt.s32.totalorder %s1135_s8, %s1135_s8 }
   0xe   :  { %p1142_p6 = por %p1141_p5, %p1140_p4 }
  0x10   :  { %p1143_p7 = pnand %p1142_p6, %p1136_p3 }
  0x12   :  { %1146 = shalt.err (!%p1143_p7)
}
  0x13   :  { %s1233_s9 = smov 128   ;;  %s1234_s10 = smov 8  }
  0x14   :  { %38 = dma.hbm_to_vmem [thread:$0]  %s1434_s1, 4096, %s33_s22, [#allocation6], %s1233_s9, %s1233_s9, %s1234_s10  }
  0x15   :  { %s1147_s15 = scalar_lea.hbm %s1433_s0, 4096 }
  0x16   :  { %p1148_p8 = scmp.ne.s32.totalorder %s1433_s0, %s1147_s15  ;;  %p1151_p9 = scmp.lt.u32.totalorder %s1147_s15, %s1433_s0 }
  0x18   :  { %p1153_p10 = pnand %p1151_p9, %p1148_p8 }
  0x1a   :  { %1156 = shalt.err (!%p1153_p10)
}
  0x1b   :  { %s1157_s20 = scalar_lea.vmem %s1273_s24, 4096  ;;  %p1162_p12 = scmp.lt.s32.totalorder %s1273_s24, %s1273_s24 }
  0x1c   :  { %p1158_p11 = scmp.ne.s32.totalorder %s1273_s24, %s1157_s20  ;;  %p1163_p13 = scmp.lt.s32.totalorder %s1157_s20, %s1157_s20 }
  0x1e   :  { %p1164_p0 = por %p1163_p13, %p1162_p12 }
  0x20   :  { %p1165_p1 = pnand %p1164_p0, %p1158_p11 }
  0x22   :  { %1168 = shalt.err (!%p1165_p1)
}
  0x23   :  { %26 = dma.hbm_to_vmem [thread:$0]  %s1433_s0, 4096, %s1273_s24, [#allocation3], %s1233_s9, %s1233_s9, %s1234_s10  }
  0x24   :  { %s1235_s22 = smov [#allocation7]   ;;  %s1236_s25 = smov [#allocation8]  }
  0x25   :  { %s44_s23 = sshll.u32 %s1235_s22, 4  ;;  %s58_s26 = sshll.u32 %s1236_s25, 4  ;;  %s45_s23 = int_to_ptr.vmem [resolvable:$true] %s44_s23  ;;  %s1310_s26 = int_to_ptr.vmem [resolvable:$true] %s58_s26 }
  0x26   :  { %s1169_s29 = scalar_lea.hbm %s1435_s2, 2048 }
  0x27   :  { %p1170_p2 = scmp.ne.s32.totalorder %s1435_s2, %s1169_s29  ;;  %p1173_p3 = scmp.lt.u32.totalorder %s1169_s29, %s1435_s2 }
  0x29   :  { %p1175_p4 = pnand %p1173_p3, %p1170_p2 }
  0x2b   :  { %1178 = shalt.err (!%p1175_p4)
}
  0x2c   :  { %s1179_s0 = scalar_lea.vmem %s45_s23, 2048  ;;  %p1184_p6 = scmp.lt.s32.totalorder %s45_s23, %s45_s23 }
  0x2d   :  { %p1180_p5 = scmp.ne.s32.totalorder %s45_s23, %s1179_s0  ;;  %p1185_p7 = scmp.lt.s32.totalorder %s1179_s0, %s1179_s0 }
  0x2f   :  { %p1186_p8 = por %p1185_p7, %p1184_p6 }
  0x31   :  { %p1187_p9 = pnand %p1186_p8, %p1180_p5 }
  0x33   :  { %1190 = shalt.err (!%p1187_p9)
}
  0x34   :  { %50 = dma.hbm_to_vmem [thread:$0]  %s1435_s2, 2048, %s45_s23, [#allocation6], %s1233_s9, %s1233_s9, %s1234_s10  }
  0x35   :  { %s1191_s15 = scalar_lea.hbm %s1437_s4, 2048 }
  0x36   :  { %p1192_p10 = scmp.ne.s32.totalorder %s1437_s4, %s1191_s15  ;;  %p1195_p11 = scmp.lt.u32.totalorder %s1191_s15, %s1437_s4 }
  0x38   :  { %p1197_p12 = pnand %p1195_p11, %p1192_p10 }
  0x3a   :  { %1200 = shalt.err (!%p1197_p12)
}
  0x3b   :  { %s1201_s20 = scalar_lea.vmem %s1310_s26, 2048  ;;  %p1206_p0 = scmp.lt.s32.totalorder %s1310_s26, %s1310_s26 }
  0x3c   :  { %p1202_p13 = scmp.ne.s32.totalorder %s1310_s26, %s1201_s20  ;;  %p1207_p1 = scmp.lt.s32.totalorder %s1201_s20, %s1201_s20 }
  0x3e   :  { %p1208_p2 = por %p1207_p1, %p1206_p0 }
  0x40   :  { %p1209_p3 = pnand %p1208_p2, %p1202_p13 }
  0x42   :  { %1212 = shalt.err (!%p1209_p3)
}
  0x43   :  { %64 = dma.hbm_to_vmem [thread:$0]  %s1437_s4, 2048, %s1310_s26, [#allocation9], %s1233_s9, %s1233_s9, %s1234_s10  }
  0x44   :  { %1223 = dma.done.wait [#allocation3], 4096  }
  0x45   :  { %1224 = vsyncadd [#allocation3], 4294963200 }
  0x46   :  { %1225 = dma.done.wait [#allocation6], 6144  }
  0x47   :  { %1226 = vsyncadd [#allocation6], 4294961152 }
  0x48   :  { %1227 = dma.done.wait [#allocation9], 2048  }
  0x49   :  { %1228 = vsyncadd [#allocation9], 4294965248  ;;  %v111_v0 = vld [vmem:[#allocation7] sm:$0xff]  ;;  %v112_v1 = vld [vmem:[#allocation7 + $0x8] sm:$0xff]  ;;  %s1213_s25 = scalar_lea.hbm %s1439_s6, 16 }
  0x4a   :  { %v113_v2 = vld [vmem:[#allocation7 + $0x10] sm:$0xff]  ;;  %v1052_v3 = vpack.c.bf16 %v112_v1, %v111_v0  ;;  %v114_v4 = vld [vmem:[#allocation7 + $0x18] sm:$0xff]  ;;  %v115_v6 = vld [vmem:[#allocation7 + $0x20] sm:$0xff]  ;;  %p1214_p4 = scmp.ne.s32.totalorder %s1439_s6, %s1213_s25  ;;  %p1217_p5 = scmp.lt.u32.totalorder %s1213_s25, %s1439_s6 }
  0x4b   :  { %v1056_v5 = vpack.c.bf16 %v114_v4, %v113_v2  ;;  %v116_v7 = vld [vmem:[#allocation7 + $0x28] sm:$0xff]  ;;  %v79_v9 = vld [vmem:[#allocation2] sm:$0xff]  ;;  %v117_v10 = vld [vmem:[#allocation7 + $0x30] sm:$0xff] }
  0x4c   :  { %1053 = vmatprep.subr.bf16.mxu0 %v1052_v3  ;;  %v1060_v8 = vpack.c.bf16 %v116_v7, %v115_v6  ;;  %v118_v11 = vld [vmem:[#allocation7 + $0x38] sm:$0xff]  ;;  %924 = vmatprep.mubr.f32.mxu0 %v79_v9  ;;  %v119_v13 = vld [vmem:[#allocation7 + $0x40] sm:$0xff]  ;;  %v120_v14 = vld [vmem:[#allocation7 + $0x48] sm:$0xff]  ;;  %p1219_p6 = pnand %p1217_p5, %p1214_p4 }
  0x4d   :  { %1055 = vmatpush3.bf16.msra.mxu0 %v1052_v3  ;;  %v1064_v12 = vpack.c.bf16 %v118_v11, %v117_v10  ;;  %v1068_v15 = vpack.c.bf16 %v120_v14, %v119_v13  ;;  %v121_v16 = vld [vmem:[#allocation7 + $0x50] sm:$0xff]  ;;  %v122_v17 = vld [vmem:[#allocation7 + $0x58] sm:$0xff]  ;;  %v127_v18 = vld [vmem:[#allocation8] sm:$0xff] }
  0x4e   :  { %1057 = vmatprep.subr.bf16.mxu0 %v1056_v5  ;;  %v128_v19 = vld [vmem:[#allocation8 + $0x8] sm:$0xff]  ;;  %v129_v20 = vld [vmem:[#allocation8 + $0x10] sm:$0xff]  ;;  %v1072_v21 = vpack.c.bf16 %v122_v17, %v121_v16  ;;  %v123_v22 = vld [vmem:[#allocation7 + $0x60] sm:$0xff] }
  0x4f   :  { %v1084_v23 = vpack.c.bf16 %v128_v19, %v127_v18  ;;  %v130_v24 = vld [vmem:[#allocation8 + $0x18] sm:$0xff]  ;;  %v124_v25 = vld [vmem:[#allocation7 + $0x68] sm:$0xff]  ;;  %v131_v27 = vld [vmem:[#allocation8 + $0x20] sm:$0xff] }
  0x50   :  { %v1088_v26 = vpack.c.bf16 %v130_v24, %v129_v20  ;;  %v132_v28 = vld [vmem:[#allocation8 + $0x28] sm:$0xff]  ;;  %v1076_v29 = vpack.c.bf16 %v124_v25, %v123_v22  ;;  %v125_v30 = vld [vmem:[#allocation7 + $0x70] sm:$0xff]  ;;  %v126_v32 = vld [vmem:[#allocation7 + $0x78] sm:$0xff] }
  0x51   :  { %1059 = vmatpush3.bf16.msra.mxu0 %v1056_v5  ;;  %1085 = vmatprep.subr.bf16.mxu1 %v1084_v23  ;;  %v1092_v31 = vpack.c.bf16 %v132_v28, %v131_v27  ;;  %v133_v33 = vld [vmem:[#allocation8 + $0x30] sm:$0xff]  ;;  %v134_v34 = vld [vmem:[#allocation8 + $0x38] sm:$0xff]  ;;  %v1080_v35 = vpack.c.bf16 %v126_v32, %v125_v30  ;;  %v135_v37 = vld [vmem:[#allocation8 + $0x40] sm:$0xff] }
  0x52   :  { %1061 = vmatprep.subr.bf16.mxu0 %v1060_v8  ;;  %1087 = vmatpush3.bf16.msra.mxu1 %v1084_v23  ;;  %v1096_v36 = vpack.c.bf16 %v134_v34, %v133_v33  ;;  %v136_v38 = vld [vmem:[#allocation8 + $0x48] sm:$0xff]  ;;  %v137_v40 = vld [vmem:[#allocation8 + $0x50] sm:$0xff]  ;;  %v138_v41 = vld [vmem:[#allocation8 + $0x58] sm:$0xff] }
  0x53   :  { %1089 = vmatprep.subr.bf16.mxu1 %v1088_v26  ;;  %v1100_v39 = vpack.c.bf16 %v136_v38, %v135_v37  ;;  %v80_v42 = vld [vmem:[#allocation2 + $0x8] sm:$0xff]  ;;  %v81_v43 = vld [vmem:[#allocation2 + $0x10] sm:$0xff]  ;;  %v1104_v44 = vpack.c.bf16 %v138_v41, %v137_v40  ;;  %v139_v45 = vld [vmem:[#allocation8 + $0x60] sm:$0xff] }
  0x54   :  { %v140_v46 = vld [vmem:[#allocation8 + $0x68] sm:$0xff]  ;;  %v82_v47 = vld [vmem:[#allocation2 + $0x18] sm:$0xff]  ;;  %v83_v48 = vld [vmem:[#allocation2 + $0x20] sm:$0xff] }
  0x55   :  { %1063 = vmatpush3.bf16.msra.mxu0 %v1060_v8  ;;  %v1108_v49 = vpack.c.bf16 %v140_v46, %v139_v45  ;;  %v84_v50 = vld [vmem:[#allocation2 + $0x28] sm:$0xff]  ;;  %v85_v51 = vld [vmem:[#allocation2 + $0x30] sm:$0xff]  ;;  %v86_v52 = vld [vmem:[#allocation2 + $0x38] sm:$0xff] }
  0x56   :  { %1065 = vmatprep.subr.bf16.mxu0 %v1064_v12  ;;  %1091 = vmatpush3.bf16.msra.mxu1 %v1088_v26  ;;  %v87_v53 = vld [vmem:[#allocation2 + $0x40] sm:$0xff]  ;;  %v88_v54 = vld [vmem:[#allocation2 + $0x48] sm:$0xff]  ;;  %v89_v55 = vld [vmem:[#allocation2 + $0x50] sm:$0xff] }
  0x57   :  { %1093 = vmatprep.subr.bf16.mxu1 %v1092_v31  ;;  %v90_v56 = vld [vmem:[#allocation2 + $0x58] sm:$0xff]  ;;  %v91_v57 = vld [vmem:[#allocation2 + $0x60] sm:$0xff]  ;;  %v92_v58 = vld [vmem:[#allocation2 + $0x68] sm:$0xff] }
  0x58   :  { %v93_v59 = vld [vmem:[#allocation2 + $0x70] sm:$0xff]  ;;  %v94_v60 = vld [vmem:[#allocation2 + $0x78] sm:$0xff]  ;;  %v95_v61 = vld [vmem:[#allocation2 + $0x80] sm:$0xff] }
  0x59   :  { %1067 = vmatpush3.bf16.msra.mxu0 %v1064_v12  ;;  %v96_v62 = vld [vmem:[#allocation2 + $0x88] sm:$0xff]  ;;  %v97_v63 = vld [vmem:[#allocation2 + $0x90] sm:$0xff]  ;;  %v98_v0 = vld [vmem:[#allocation2 + $0x98] sm:$0xff] }
  0x5a   :  { %1069 = vmatprep.subr.bf16.mxu0 %v1068_v15  ;;  %1095 = vmatpush3.bf16.msra.mxu1 %v1092_v31  ;;  %v99_v1 = vld [vmem:[#allocation2 + $0xa0] sm:$0xff]  ;;  %v100_v2 = vld [vmem:[#allocation2 + $0xa8] sm:$0xff]  ;;  %v101_v3 = vld [vmem:[#allocation2 + $0xb0] sm:$0xff] }
  0x5b   :  { %1097 = vmatprep.subr.bf16.mxu1 %v1096_v36  ;;  %v102_v4 = vld [vmem:[#allocation2 + $0xb8] sm:$0xff]  ;;  %v103_v5 = vld [vmem:[#allocation2 + $0xc0] sm:$0xff]  ;;  %v104_v6 = vld [vmem:[#allocation2 + $0xc8] sm:$0xff] }
  0x5c   :  { %v105_v7 = vld [vmem:[#allocation2 + $0xd0] sm:$0xff]  ;;  %v106_v8 = vld [vmem:[#allocation2 + $0xd8] sm:$0xff]  ;;  %v107_v9 = vld [vmem:[#allocation2 + $0xe0] sm:$0xff] }
  0x5d   :  { %1071 = vmatpush3.bf16.msra.mxu0 %v1068_v15  ;;  %v108_v10 = vld [vmem:[#allocation2 + $0xe8] sm:$0xff]  ;;  %v109_v11 = vld [vmem:[#allocation2 + $0xf0] sm:$0xff]  ;;  %v110_v12 = vld [vmem:[#allocation2 + $0xf8] sm:$0xff] }
  0x5e   :  { %1073 = vmatprep.subr.bf16.mxu0 %v1072_v21  ;;  %1099 = vmatpush3.bf16.msra.mxu1 %v1096_v36  ;;  %v141_v13 = vld [vmem:[#allocation8 + $0x70] sm:$0xff]  ;;  %v142_v14 = vld [vmem:[#allocation8 + $0x78] sm:$0xff]  ;;  %v1350_v16 = vld [vmem:[%s1436_s3] ss:$0 sm:$0xff] }
  0x5f   :  { %1101 = vmatprep.subr.bf16.mxu1 %v1100_v39  ;;  %v1112_v15 = vpack.c.bf16 %v142_v14, %v141_v13 }
  0x61   :  { %1075 = vmatpush3.bf16.msra.mxu0 %v1072_v21 }
  0x62   :  { %1077 = vmatprep.subr.bf16.mxu0 %v1076_v29  ;;  %1103 = vmatpush3.bf16.msra.mxu1 %v1100_v39 }
  0x63   :  { %1105 = vmatprep.subr.bf16.mxu1 %v1104_v44 }
  0x65   :  { %1079 = vmatpush3.bf16.msra.mxu0 %v1076_v29 }
  0x66   :  { %1081 = vmatprep.subr.bf16.mxu0 %v1080_v35  ;;  %1107 = vmatpush3.bf16.msra.mxu1 %v1104_v44 }
  0x67   :  { %1109 = vmatprep.subr.bf16.mxu1 %v1108_v49 }
  0x69   :  { %1083 = vmatpush3.bf16.msra.mxu0 %v1080_v35 }
  0x6a   :  { %1111 = vmatpush3.bf16.msra.mxu1 %v1108_v49 }
  0x6b   :  { %1113 = vmatprep.subr.bf16.mxu1 %v1112_v15 }
  0x6c   :  { %925 = vmatmul.mubr.f32.vlgmr.msra.gmra.mrb[0].mxu0 %v80_v42 }
  0x6d   :  { %927 = vmatprep.mubr.f32.mxu0 %v81_v43 }
  0x6e   :  { %1115 = vmatpush3.bf16.msra.mxu1 %v1112_v15 }
  0x70   :  { %928 = vmatmul.mubr.f32.gmra.mrb[2].mxu0 %v82_v47 }
  0x71   :  { %930 = vmatprep.mubr.f32.mxu0 %v83_v48 }
  0x74   :  { %931 = vmatmul.mubr.f32.gmra.mrb[4].mxu0 %v84_v50 }
  0x75   :  { %933 = vmatprep.mubr.f32.mxu0 %v85_v51 }
  0x78   :  { %934 = vmatmul.mubr.f32.gmra.mrb[6].mxu0 %v86_v52 }
  0x79   :  { %936 = vmatprep.mubr.f32.mxu0 %v87_v53 }
  0x7c   :  { %937 = vmatmul.mubr.f32.gmra.mrb[8].mxu0 %v88_v54 }
  0x7d   :  { %939 = vmatprep.mubr.f32.mxu0 %v89_v55 }
  0x80   :  { %940 = vmatmul.mubr.f32.gmra.mrb[10].mxu0 %v90_v56 }
  0x81   :  { %942 = vmatprep.mubr.f32.mxu0 %v91_v57 }
  0x84   :  { %943 = vmatmul.mubr.f32.gmra.mrb[12].mxu0 %v92_v58 }
  0x85   :  { %945 = vmatprep.mubr.f32.mxu0 %v93_v59 }
  0x88   :  { %946 = vmatmul.mubr.f32.gmra.mrb[14].mxu0 %v94_v60 }
  0x89   :  { %948 = vmatprep.mubr.f32.mxu0 %v95_v61 }
  0x8c   :  { %949 = vmatmul.mubr.f32.gmra.mrb[16].mxu0 %v96_v62 }
  0x8d   :  { %951 = vmatprep.mubr.f32.mxu0 %v97_v63 }
  0x90   :  { %952 = vmatmul.mubr.f32.gmra.mrb[18].mxu0 %v98_v0 }
  0x91   :  { %954 = vmatprep.mubr.f32.mxu0 %v99_v1 }
  0x94   :  { %955 = vmatmul.mubr.f32.gmra.mrb[20].mxu0 %v100_v2 }
  0x95   :  { %957 = vmatprep.mubr.f32.mxu0 %v101_v3 }
  0x98   :  { %958 = vmatmul.mubr.f32.gmra.mrb[22].mxu0 %v102_v4 }
  0x99   :  { %960 = vmatprep.mubr.f32.mxu0 %v103_v5 }
  0x9c   :  { %961 = vmatmul.mubr.f32.gmra.mrb[24].mxu0 %v104_v6 }
  0x9d   :  { %963 = vmatprep.mubr.f32.mxu0 %v105_v7 }
  0xa0   :  { %964 = vmatmul.mubr.f32.gmra.mrb[26].mxu0 %v106_v8 }
  0xa1   :  { %966 = vmatprep.mubr.f32.mxu0 %v107_v9 }
  0xa4   :  { %967 = vmatmul.mubr.f32.gmra.mrb[28].mxu0 %v108_v10 }
  0xa5   :  { %969 = vmatprep.mubr.f32.mxu0 %v109_v11 }
  0xa8   :  { %970 = vmatmul.mubr.f32.gmra.mrb[30].mxu0 %v110_v12 }
 0x13f   :  { %v926_v17 = vpop.f32.mrb[0].mxu0 }
 0x140   :  { %v222_v18 = vadd.f32 %v926_v17, %v1350_v16  ;;  %v216_v19 = vpop.f32.mrb[1].mxu0 }
 0x141   :  { %v217_v20 = vadd.f32 %v1350_v16, %v216_v19 }
 0x142   :  { %v376_v23 = vmax.f32 %v222_v18, 0.0 }
 0x143   :  { %v929_v21 = vpop.f32.mrb[2].mxu0  ;;  %v375_v22 = vmax.f32 %v217_v20, 0.0 }
 0x144   :  { %v232_v24 = vadd.f32 %v929_v21, %v1350_v16  ;;  %v226_v25 = vpop.f32.mrb[3].mxu0 }
 0x145   :  { %v227_v26 = vadd.f32 %v1350_v16, %v226_v25  ;;  %1004 = vmatprep.mubr.f32.mxu1 %v375_v22 }
 0x146   :  { %1005 = vmatmul.mubr.f32.vlgmr.msra.gmra.mrb[0].mxu1 %v376_v23  ;;  %v378_v29 = vmax.f32 %v232_v24, 0.0 }
 0x147   :  { %v377_v27 = vmax.f32 %v227_v26, 0.0  ;;  %v932_v28 = vpop.f32.mrb[4].mxu0 }
 0x148   :  { %v242_v30 = vadd.f32 %v932_v28, %v1350_v16  ;;  %v236_v31 = vpop.f32.mrb[5].mxu0 }
 0x149   :  { %v237_v32 = vadd.f32 %v1350_v16, %v236_v31  ;;  %1007 = vmatprep.mubr.f32.mxu1 %v377_v27 }
 0x14a   :  { %1008 = vmatmul.mubr.f32.gmra.mrb[2].mxu1 %v378_v29  ;;  %v380_v35 = vmax.f32 %v242_v30, 0.0 }
 0x14b   :  { %v379_v33 = vmax.f32 %v237_v32, 0.0  ;;  %v935_v34 = vpop.f32.mrb[6].mxu0 }
 0x14c   :  { %v252_v36 = vadd.f32 %v935_v34, %v1350_v16  ;;  %v246_v37 = vpop.f32.mrb[7].mxu0 }
 0x14d   :  { %v247_v38 = vadd.f32 %v1350_v16, %v246_v37  ;;  %1010 = vmatprep.mubr.f32.mxu1 %v379_v33 }
 0x14e   :  { %1011 = vmatmul.mubr.f32.gmra.mrb[4].mxu1 %v380_v35  ;;  %v382_v41 = vmax.f32 %v252_v36, 0.0 }
 0x14f   :  { %v381_v39 = vmax.f32 %v247_v38, 0.0  ;;  %v938_v40 = vpop.f32.mrb[8].mxu0 }
 0x150   :  { %v262_v42 = vadd.f32 %v938_v40, %v1350_v16  ;;  %v256_v43 = vpop.f32.mrb[9].mxu0 }
 0x151   :  { %v257_v44 = vadd.f32 %v1350_v16, %v256_v43  ;;  %1013 = vmatprep.mubr.f32.mxu1 %v381_v39 }
 0x152   :  { %1014 = vmatmul.mubr.f32.gmra.mrb[6].mxu1 %v382_v41  ;;  %v384_v47 = vmax.f32 %v262_v42, 0.0 }
 0x153   :  { %v383_v45 = vmax.f32 %v257_v44, 0.0  ;;  %v941_v46 = vpop.f32.mrb[10].mxu0 }
 0x154   :  { %v272_v48 = vadd.f32 %v941_v46, %v1350_v16  ;;  %v266_v49 = vpop.f32.mrb[11].mxu0 }
 0x155   :  { %v267_v50 = vadd.f32 %v1350_v16, %v266_v49  ;;  %1016 = vmatprep.mubr.f32.mxu1 %v383_v45 }
 0x156   :  { %1017 = vmatmul.mubr.f32.gmra.mrb[8].mxu1 %v384_v47  ;;  %v386_v53 = vmax.f32 %v272_v48, 0.0 }
 0x157   :  { %v385_v51 = vmax.f32 %v267_v50, 0.0  ;;  %v944_v52 = vpop.f32.mrb[12].mxu0  ;;  %v1387_v50 = vld [vmem:[%s1438_s5] ss:$0 sm:$0xff] }
 0x158   :  { %v282_v54 = vadd.f32 %v944_v52, %v1350_v16  ;;  %v276_v55 = vpop.f32.mrb[13].mxu0  ;;  %v640_v52 = vld [vmem:[#allocation5 + $0x8] sm:$0xff] }
 0x159   :  { %v277_v56 = vadd.f32 %v1350_v16, %v276_v55  ;;  %1019 = vmatprep.mubr.f32.mxu1 %v385_v51  ;;  %v639_v55 = vld [vmem:[#allocation5] sm:$0xff] }
 0x15a   :  { %1020 = vmatmul.mubr.f32.gmra.mrb[10].mxu1 %v386_v53  ;;  %v388_v59 = vmax.f32 %v282_v54, 0.0 }
 0x15b   :  { %v387_v57 = vmax.f32 %v277_v56, 0.0  ;;  %v947_v58 = vpop.f32.mrb[14].mxu0 }
 0x15c   :  { %v292_v60 = vadd.f32 %v947_v58, %v1350_v16  ;;  %v286_v61 = vpop.f32.mrb[15].mxu0 }
 0x15d   :  { %v287_v62 = vadd.f32 %v1350_v16, %v286_v61  ;;  %1022 = vmatprep.mubr.f32.mxu1 %v387_v57  ;;  %v642_v61 = vld [vmem:[#allocation5 + $0x18] sm:$0xff] }
 0x15e   :  { %1023 = vmatmul.mubr.f32.gmra.mrb[12].mxu1 %v388_v59  ;;  %v390_v1 = vmax.f32 %v292_v60, 0.0 }
 0x15f   :  { %v389_v63 = vmax.f32 %v287_v62, 0.0  ;;  %v950_v0 = vpop.f32.mrb[16].mxu0 }
 0x160   :  { %v302_v2 = vadd.f32 %v950_v0, %v1350_v16  ;;  %v296_v3 = vpop.f32.mrb[17].mxu0 }
 0x161   :  { %v297_v4 = vadd.f32 %v1350_v16, %v296_v3  ;;  %1025 = vmatprep.mubr.f32.mxu1 %v389_v63  ;;  %v641_v63 = vld [vmem:[#allocation5 + $0x10] sm:$0xff] }
 0x162   :  { %1026 = vmatmul.mubr.f32.gmra.mrb[14].mxu1 %v390_v1  ;;  %v392_v7 = vmax.f32 %v302_v2, 0.0 }
 0x163   :  { %v391_v5 = vmax.f32 %v297_v4, 0.0  ;;  %v953_v6 = vpop.f32.mrb[18].mxu0 }
 0x164   :  { %v312_v8 = vadd.f32 %v953_v6, %v1350_v16  ;;  %v306_v9 = vpop.f32.mrb[19].mxu0 }
 0x165   :  { %v307_v10 = vadd.f32 %v1350_v16, %v306_v9  ;;  %1028 = vmatprep.mubr.f32.mxu1 %v391_v5  ;;  %v643_v9 = vld [vmem:[#allocation5 + $0x20] sm:$0xff] }
 0x166   :  { %1029 = vmatmul.mubr.f32.gmra.mrb[16].mxu1 %v392_v7  ;;  %v394_v13 = vmax.f32 %v312_v8, 0.0  ;;  %v644_v7 = vld [vmem:[#allocation5 + $0x28] sm:$0xff] }
 0x167   :  { %v393_v11 = vmax.f32 %v307_v10, 0.0  ;;  %v956_v12 = vpop.f32.mrb[20].mxu0 }
 0x168   :  { %v322_v14 = vadd.f32 %v956_v12, %v1350_v16  ;;  %v316_v15 = vpop.f32.mrb[21].mxu0 }
 0x169   :  { %v317_v17 = vadd.f32 %v1350_v16, %v316_v15  ;;  %1031 = vmatprep.mubr.f32.mxu1 %v393_v11 }
 0x16a   :  { %1032 = vmatmul.mubr.f32.gmra.mrb[18].mxu1 %v394_v13  ;;  %v396_v20 = vmax.f32 %v322_v14, 0.0 }
 0x16b   :  { %v395_v18 = vmax.f32 %v317_v17, 0.0  ;;  %v959_v19 = vpop.f32.mrb[22].mxu0 }
 0x16c   :  { %v332_v21 = vadd.f32 %v959_v19, %v1350_v16  ;;  %v326_v22 = vpop.f32.mrb[23].mxu0  ;;  %v646_v19 = vld [vmem:[#allocation5 + $0x38] sm:$0xff] }
 0x16d   :  { %v327_v23 = vadd.f32 %v1350_v16, %v326_v22  ;;  %1034 = vmatprep.mubr.f32.mxu1 %v395_v18 }
 0x16e   :  { %1035 = vmatmul.mubr.f32.gmra.mrb[20].mxu1 %v396_v20  ;;  %v398_v26 = vmax.f32 %v332_v21, 0.0  ;;  %v645_v21 = vld [vmem:[#allocation5 + $0x30] sm:$0xff] }
 0x16f   :  { %v397_v24 = vmax.f32 %v327_v23, 0.0  ;;  %v962_v25 = vpop.f32.mrb[24].mxu0 }
 0x170   :  { %v342_v27 = vadd.f32 %v962_v25, %v1350_v16  ;;  %v336_v28 = vpop.f32.mrb[25].mxu0 }
 0x171   :  { %v337_v29 = vadd.f32 %v1350_v16, %v336_v28  ;;  %1037 = vmatprep.mubr.f32.mxu1 %v397_v24 }
 0x172   :  { %1038 = vmatmul.mubr.f32.gmra.mrb[22].mxu1 %v398_v26  ;;  %v400_v32 = vmax.f32 %v342_v27, 0.0 }
 0x173   :  { %v399_v30 = vmax.f32 %v337_v29, 0.0  ;;  %v965_v31 = vpop.f32.mrb[26].mxu0 }
 0x174   :  { %v352_v33 = vadd.f32 %v965_v31, %v1350_v16  ;;  %v346_v34 = vpop.f32.mrb[27].mxu0  ;;  %v648_v31 = vld [vmem:[#allocation5 + $0x48] sm:$0xff] }
 0x175   :  { %v347_v35 = vadd.f32 %v1350_v16, %v346_v34  ;;  %1040 = vmatprep.mubr.f32.mxu1 %v399_v30 }
 0x176   :  { %1041 = vmatmul.mubr.f32.gmra.mrb[24].mxu1 %v400_v32  ;;  %v402_v38 = vmax.f32 %v352_v33, 0.0  ;;  %v647_v33 = vld [vmem:[#allocation5 + $0x40] sm:$0xff] }
 0x177   :  { %v401_v36 = vmax.f32 %v347_v35, 0.0  ;;  %v968_v37 = vpop.f32.mrb[28].mxu0 }
 0x178   :  { %v362_v39 = vadd.f32 %v968_v37, %v1350_v16  ;;  %v356_v40 = vpop.f32.mrb[29].mxu0 }
 0x179   :  { %v357_v41 = vadd.f32 %v1350_v16, %v356_v40  ;;  %1043 = vmatprep.mubr.f32.mxu1 %v401_v36 }
 0x17a   :  { %1044 = vmatmul.mubr.f32.gmra.mrb[26].mxu1 %v402_v38  ;;  %v404_v44 = vmax.f32 %v362_v39, 0.0 }
 0x17b   :  { %v403_v42 = vmax.f32 %v357_v41, 0.0  ;;  %v971_v43 = vpop.f32.mrb[30].mxu0 }
 0x17c   :  { %v372_v45 = vadd.f32 %v971_v43, %v1350_v16  ;;  %v366_v46 = vpop.f32.mrb[31].mxu0  ;;  %v650_v43 = vld [vmem:[#allocation5 + $0x58] sm:$0xff] }
 0x17d   :  { %v367_v47 = vadd.f32 %v1350_v16, %v366_v46  ;;  %1046 = vmatprep.mubr.f32.mxu1 %v403_v42 }
 0x17e   :  { %1047 = vmatmul.mubr.f32.gmra.mrb[28].mxu1 %v404_v44  ;;  %v406_v49 = vmax.f32 %v372_v45, 0.0  ;;  %v649_v45 = vld [vmem:[#allocation5 + $0x50] sm:$0xff] }
 0x17f   :  { %v405_v48 = vmax.f32 %v367_v47, 0.0 }
 0x181   :  { %1049 = vmatprep.mubr.f32.mxu1 %v405_v48 }
 0x182   :  { %1050 = vmatmul.mubr.f32.gmra.mrb[30].mxu1 %v406_v49 }
 0x219   :  { %v1006_v51 = vpop.f32.mrb[0].mxu1 }
 0x21a   :  { %v486_v53 = vadd.f32 %v1006_v51, %v1387_v50  ;;  %v480_v54 = vpop.f32.mrb[1].mxu1 }
 0x21b   :  { %v481_v56 = vadd.f32 %v1387_v50, %v480_v54 }
 0x21c   :  { %v672_v16 = vsub.f32 %v486_v53, %v640_v52 }
 0x21d   :  { %v671_v57 = vsub.f32 %v481_v56, %v639_v55  ;;  %v1009_v58 = vpop.f32.mrb[2].mxu1  ;;  %v652_v56 = vld [vmem:[#allocation5 + $0x68] sm:$0xff] }
 0x21e   :  { %v704_v59 = vmul.f32 %v672_v16, %v672_v16  ;;  %v496_v60 = vadd.f32 %v1009_v58, %v1387_v50  ;;  %v490_v62 = vpop.f32.mrb[3].mxu1 }
 0x21f   :  { %v703_v0 = vmul.f32 %v671_v57, %v671_v57  ;;  %v491_v1 = vadd.f32 %v1387_v50, %v490_v62  ;;  %v651_v57 = vld [vmem:[#allocation5 + $0x60] sm:$0xff] }
 0x220   :  { %v674_v3 = vsub.f32 %v496_v60, %v642_v61 }
 0x221   :  { %v735_v2 = vadd.f32 %v704_v59, %v703_v0  ;;  %v673_v4 = vsub.f32 %v491_v1, %v641_v63  ;;  %v1012_v5 = vpop.f32.mrb[4].mxu1 }
 0x222   :  { %v506_v6 = vadd.f32 %v1012_v5, %v1387_v50  ;;  %v500_v8 = vpop.f32.mrb[5].mxu1  ;;  %v706_v12 = vmul.f32 %v674_v3, %v674_v3  ;;  %v654_v3 = vld [vmem:[#allocation5 + $0x78] sm:$0xff]  ;;  %v653_v5 = vld [vmem:[#allocation5 + $0x70] sm:$0xff] }
 0x223   :  { %v705_v10 = vmul.f32 %v673_v4, %v673_v4  ;;  %v501_v11 = vadd.f32 %v1387_v50, %v500_v8 }
 0x224   :  { %v676_v14 = vsub.f32 %v506_v6, %v644_v7 }
 0x225   :  { %v736_v13 = vadd.f32 %v735_v2, %v705_v10  ;;  %v675_v15 = vsub.f32 %v501_v11, %v643_v9  ;;  %v1015_v17 = vpop.f32.mrb[6].mxu1 }
 0x226   :  { %v516_v18 = vadd.f32 %v1015_v17, %v1387_v50  ;;  %v510_v20 = vpop.f32.mrb[7].mxu1  ;;  %v708_v25 = vmul.f32 %v676_v14, %v676_v14 }
 0x227   :  { %v707_v22 = vmul.f32 %v675_v15, %v675_v15  ;;  %v737_v23 = vadd.f32 %v736_v13, %v706_v12  ;;  %v511_v24 = vadd.f32 %v1387_v50, %v510_v20  ;;  %v656_v15 = vld [vmem:[#allocation5 + $0x88] sm:$0xff] }
 0x228   :  { %v678_v27 = vsub.f32 %v516_v18, %v646_v19  ;;  %v655_v18 = vld [vmem:[#allocation5 + $0x80] sm:$0xff] }
 0x229   :  { %v738_v26 = vadd.f32 %v737_v23, %v707_v22  ;;  %v677_v28 = vsub.f32 %v511_v24, %v645_v21  ;;  %v1018_v29 = vpop.f32.mrb[8].mxu1 }
 0x22a   :  { %v526_v30 = vadd.f32 %v1018_v29, %v1387_v50  ;;  %v520_v32 = vpop.f32.mrb[9].mxu1  ;;  %v710_v37 = vmul.f32 %v678_v27, %v678_v27 }
 0x22b   :  { %v709_v34 = vmul.f32 %v677_v28, %v677_v28  ;;  %v739_v35 = vadd.f32 %v738_v26, %v708_v25  ;;  %v521_v36 = vadd.f32 %v1387_v50, %v520_v32  ;;  %v658_v28 = vld [vmem:[#allocation5 + $0x98] sm:$0xff] }
 0x22c   :  { %v680_v39 = vsub.f32 %v526_v30, %v648_v31  ;;  %v657_v30 = vld [vmem:[#allocation5 + $0x90] sm:$0xff] }
 0x22d   :  { %v740_v38 = vadd.f32 %v739_v35, %v709_v34  ;;  %v679_v40 = vsub.f32 %v521_v36, %v647_v33  ;;  %v1021_v41 = vpop.f32.mrb[10].mxu1 }
 0x22e   :  { %v536_v42 = vadd.f32 %v1021_v41, %v1387_v50  ;;  %v530_v44 = vpop.f32.mrb[11].mxu1  ;;  %v712_v49 = vmul.f32 %v680_v39, %v680_v39 }
 0x22f   :  { %v711_v46 = vmul.f32 %v679_v40, %v679_v40  ;;  %v741_v47 = vadd.f32 %v740_v38, %v710_v37  ;;  %v531_v48 = vadd.f32 %v1387_v50, %v530_v44  ;;  %v660_v40 = vld [vmem:[#allocation5 + $0xa8] sm:$0xff] }
 0x230   :  { %v682_v52 = vsub.f32 %v536_v42, %v650_v43  ;;  %v659_v42 = vld [vmem:[#allocation5 + $0xa0] sm:$0xff] }
 0x231   :  { %v742_v51 = vadd.f32 %v741_v47, %v711_v46  ;;  %v681_v53 = vsub.f32 %v531_v48, %v649_v45  ;;  %v1024_v54 = vpop.f32.mrb[12].mxu1 }
 0x232   :  { %v546_v55 = vadd.f32 %v1024_v54, %v1387_v50  ;;  %v540_v16 = vpop.f32.mrb[13].mxu1  ;;  %v714_v61 = vmul.f32 %v682_v52, %v682_v52 }
 0x233   :  { %v713_v58 = vmul.f32 %v681_v53, %v681_v53  ;;  %v743_v59 = vadd.f32 %v742_v51, %v712_v49  ;;  %v541_v60 = vadd.f32 %v1387_v50, %v540_v16  ;;  %v662_v53 = vld [vmem:[#allocation5 + $0xb8] sm:$0xff] }
 0x234   :  { %v684_v63 = vsub.f32 %v546_v55, %v652_v56  ;;  %v661_v55 = vld [vmem:[#allocation5 + $0xb0] sm:$0xff] }
 0x235   :  { %v744_v62 = vadd.f32 %v743_v59, %v713_v58  ;;  %v683_v0 = vsub.f32 %v541_v60, %v651_v57  ;;  %v1027_v1 = vpop.f32.mrb[14].mxu1 }
 0x236   :  { %v556_v2 = vadd.f32 %v1027_v1, %v1387_v50  ;;  %v550_v4 = vpop.f32.mrb[15].mxu1  ;;  %v716_v9 = vmul.f32 %v684_v63, %v684_v63 }
 0x237   :  { %v715_v6 = vmul.f32 %v683_v0, %v683_v0  ;;  %v745_v7 = vadd.f32 %v744_v62, %v714_v61  ;;  %v551_v8 = vadd.f32 %v1387_v50, %v550_v4  ;;  %v664_v0 = vld [vmem:[#allocation5 + $0xc8] sm:$0xff] }
 0x238   :  { %v686_v11 = vsub.f32 %v556_v2, %v654_v3  ;;  %v663_v2 = vld [vmem:[#allocation5 + $0xc0] sm:$0xff] }
 0x239   :  { %v746_v10 = vadd.f32 %v745_v7, %v715_v6  ;;  %v685_v12 = vsub.f32 %v551_v8, %v653_v5  ;;  %v1030_v13 = vpop.f32.mrb[16].mxu1 }
 0x23a   :  { %v566_v14 = vadd.f32 %v1030_v13, %v1387_v50  ;;  %v560_v17 = vpop.f32.mrb[17].mxu1  ;;  %v718_v22 = vmul.f32 %v686_v11, %v686_v11 }
 0x23b   :  { %v717_v19 = vmul.f32 %v685_v12, %v685_v12  ;;  %v747_v20 = vadd.f32 %v746_v10, %v716_v9  ;;  %v561_v21 = vadd.f32 %v1387_v50, %v560_v17  ;;  %v666_v12 = vld [vmem:[#allocation5 + $0xd8] sm:$0xff] }
 0x23c   :  { %v688_v24 = vsub.f32 %v566_v14, %v656_v15  ;;  %v665_v14 = vld [vmem:[#allocation5 + $0xd0] sm:$0xff] }
 0x23d   :  { %v748_v23 = vadd.f32 %v747_v20, %v717_v19  ;;  %v687_v25 = vsub.f32 %v561_v21, %v655_v18  ;;  %v1033_v26 = vpop.f32.mrb[18].mxu1 }
 0x23e   :  { %v576_v27 = vadd.f32 %v1033_v26, %v1387_v50  ;;  %v570_v29 = vpop.f32.mrb[19].mxu1  ;;  %v720_v34 = vmul.f32 %v688_v24, %v688_v24 }
 0x23f   :  { %v719_v31 = vmul.f32 %v687_v25, %v687_v25  ;;  %v749_v32 = vadd.f32 %v748_v23, %v718_v22  ;;  %v571_v33 = vadd.f32 %v1387_v50, %v570_v29  ;;  %v668_v25 = vld [vmem:[#allocation5 + $0xe8] sm:$0xff] }
 0x240   :  { %v690_v36 = vsub.f32 %v576_v27, %v658_v28  ;;  %v667_v27 = vld [vmem:[#allocation5 + $0xe0] sm:$0xff] }
 0x241   :  { %v750_v35 = vadd.f32 %v749_v32, %v719_v31  ;;  %v689_v37 = vsub.f32 %v571_v33, %v657_v30  ;;  %v1036_v38 = vpop.f32.mrb[20].mxu1 }
 0x242   :  { %v586_v39 = vadd.f32 %v1036_v38, %v1387_v50  ;;  %v580_v41 = vpop.f32.mrb[21].mxu1  ;;  %v722_v46 = vmul.f32 %v690_v36, %v690_v36  ;;  %v669_v38 = vld [vmem:[#allocation5 + $0xf0] sm:$0xff] }
 0x243   :  { %v721_v43 = vmul.f32 %v689_v37, %v689_v37  ;;  %v751_v44 = vadd.f32 %v750_v35, %v720_v34  ;;  %v581_v45 = vadd.f32 %v1387_v50, %v580_v41 }
 0x244   :  { %v692_v48 = vsub.f32 %v586_v39, %v660_v40  ;;  %v670_v39 = vld [vmem:[#allocation5 + $0xf8] sm:$0xff] }
 0x245   :  { %v752_v47 = vadd.f32 %v751_v44, %v721_v43  ;;  %v691_v49 = vsub.f32 %v581_v45, %v659_v42  ;;  %v1039_v51 = vpop.f32.mrb[22].mxu1 }
 0x246   :  { %v596_v52 = vadd.f32 %v1039_v51, %v1387_v50  ;;  %v590_v54 = vpop.f32.mrb[23].mxu1  ;;  %v724_v58 = vmul.f32 %v692_v48, %v692_v48 }
 0x247   :  { %v723_v56 = vmul.f32 %v691_v49, %v691_v49  ;;  %v753_v16 = vadd.f32 %v752_v47, %v722_v46  ;;  %v591_v57 = vadd.f32 %v1387_v50, %v590_v54 }
 0x248   :  { %v694_v60 = vsub.f32 %v596_v52, %v662_v53 }
 0x249   :  { %v754_v59 = vadd.f32 %v753_v16, %v723_v56  ;;  %v693_v61 = vsub.f32 %v591_v57, %v661_v55  ;;  %v1042_v62 = vpop.f32.mrb[24].mxu1 }
 0x24a   :  { %v606_v63 = vadd.f32 %v1042_v62, %v1387_v50  ;;  %v600_v1 = vpop.f32.mrb[25].mxu1  ;;  %v726_v6 = vmul.f32 %v694_v60, %v694_v60 }
 0x24b   :  { %v725_v3 = vmul.f32 %v693_v61, %v693_v61  ;;  %v755_v4 = vadd.f32 %v754_v59, %v724_v58  ;;  %v601_v5 = vadd.f32 %v1387_v50, %v600_v1 }
 0x24c   :  { %v696_v8 = vsub.f32 %v606_v63, %v664_v0 }
 0x24d   :  { %v756_v7 = vadd.f32 %v755_v4, %v725_v3  ;;  %v695_v9 = vsub.f32 %v601_v5, %v663_v2  ;;  %v1045_v10 = vpop.f32.mrb[26].mxu1 }
 0x24e   :  { %v616_v11 = vadd.f32 %v1045_v10, %v1387_v50  ;;  %v610_v13 = vpop.f32.mrb[27].mxu1  ;;  %v728_v19 = vmul.f32 %v696_v8, %v696_v8 }
 0x24f   :  { %v727_v15 = vmul.f32 %v695_v9, %v695_v9  ;;  %v757_v17 = vadd.f32 %v756_v7, %v726_v6  ;;  %v611_v18 = vadd.f32 %v1387_v50, %v610_v13 }
 0x250   :  { %v698_v21 = vsub.f32 %v616_v11, %v666_v12 }
 0x251   :  { %v758_v20 = vadd.f32 %v757_v17, %v727_v15  ;;  %v697_v22 = vsub.f32 %v611_v18, %v665_v14  ;;  %v1048_v23 = vpop.f32.mrb[28].mxu1 }
 0x252   :  { %v626_v24 = vadd.f32 %v1048_v23, %v1387_v50  ;;  %v620_v26 = vpop.f32.mrb[29].mxu1  ;;  %v730_v31 = vmul.f32 %v698_v21, %v698_v21 }
 0x253   :  { %v729_v28 = vmul.f32 %v697_v22, %v697_v22  ;;  %v759_v29 = vadd.f32 %v758_v20, %v728_v19  ;;  %v621_v30 = vadd.f32 %v1387_v50, %v620_v26 }
 0x254   :  { %v700_v33 = vsub.f32 %v626_v24, %v668_v25 }
 0x255   :  { %v760_v32 = vadd.f32 %v759_v29, %v729_v28  ;;  %v699_v34 = vsub.f32 %v621_v30, %v667_v27  ;;  %v1051_v35 = vpop.f32.mrb[30].mxu1 }
 0x256   :  { %v636_v36 = vadd.f32 %v1051_v35, %v1387_v50  ;;  %v630_v37 = vpop.f32.mrb[31].mxu1  ;;  %v732_v43 = vmul.f32 %v700_v33, %v700_v33 }
 0x257   :  { %v731_v40 = vmul.f32 %v699_v34, %v699_v34  ;;  %v761_v41 = vadd.f32 %v760_v32, %v730_v31  ;;  %v631_v42 = vadd.f32 %v1387_v50, %v630_v37 }
 0x258   :  { %v702_v46 = vsub.f32 %v636_v36, %v670_v39 }
 0x259   :  { %v762_v44 = vadd.f32 %v761_v41, %v731_v40  ;;  %v701_v45 = vsub.f32 %v631_v42, %v669_v38 }
 0x25a   :  { %v734_v49 = vmul.f32 %v702_v46, %v702_v46 }
 0x25b   :  { %v733_v47 = vmul.f32 %v701_v45, %v701_v45  ;;  %v763_v48 = vadd.f32 %v762_v44, %v732_v43 }
 0x25d   :  { %v764_v51 = vadd.f32 %v763_v48, %v733_v47 }
 0x25f   :  { %v765_v52 = vadd.f32 %v764_v51, %v734_v49 }
 0x261   :  { %766 = vadd.xlane.f32.xlu0 %v765_v52 }
 0x2ee   :  { %v767_v53 = vpop.xlane.xlu0 %766 }
 0x2ef   :  { %v768_v54 = vrot.slane %v767_v53, 4 }
 0x2f1   :  { %v769_v55 = vadd.f32 %v768_v54, %v767_v53 }
 0x2f3   :  { %v770_v56 = vrot.slane %v769_v55, 2 }
 0x2f5   :  { %v771_v16 = vadd.f32 %v770_v56, %v769_v55 }
 0x2f7   :  { %v772_v57 = vrot.slane %v771_v16, 1 }
 0x2f9   :  { %v773_v58 = vadd.f32 %v772_v57, %v771_v16 }
 0x2fb   :  { %1116 = vpush %v773_v58 }
 0x32c   :  { %s1117_s5 = spop %1116 }
 0x32d   :  { %s775_s21 = smul.f32 3.0517578e-05, %s1117_s5 }
 0x32f   :  { %777 = sst [smem:[#allocation10]] %s775_s21 }
 0x330   :  { %1222 = shalt.err (!%p1219_p6)
}
 0x331   :  { %s1237_s30 = smov [#allocation10]  }
 0x332   :  { %785 = dma.smem_to_hbm %s1237_s30, 16, %s1439_s6, [#allocation4]  }
 0x333   :  { %1229 = dma.done.wait [#allocation4], 16  }
 0x334   :  { %1230 = vsyncadd [#allocation4], 4294967280 }
 0x335   :  { %789 = sfence }
 0x336   :  { %790 = vsyncpa [#allocation3], 1 }
 0x337   :  { %791 = vsyncpa [#allocation6], 1 }
 0x338   :  { %792 = vsyncpa [#allocation9], 1 }
 0x339   :  { %793 = vsyncpa [#allocation4], 1 }

</bundles_post_ra>
